<compile_context>
chip_gen: v6e
topology: v6e:2x2x1
jax: 0.10.0
libtpu: 0.0.40
codegen_flags: <defaults>
</compile_context>

<pallas_src>
import functools
import math

import jax
import jax.numpy as jnp
from jax.experimental import pallas as pl
from jax.experimental.pallas import tpu as pltpu

_LANES = 128
# (4096, 128) f32 tile = 2 MiB per buffer; x + out, double-buffered = 8 MiB.
# Safe under every generation's scoped-VMEM default (16 MiB v5e, 32 MiB
# v6e/v7x).  TODO(synk): on v6e, row_tile=8192..16384 + vmem_limit_bytes
# recovers the last ~10-15% of HBM roofline.
_DEFAULT_ROW_TILE = 4096


def _round_up(x: int, m: int) -> int:
    return (x + m - 1) // m * m


def _sublanes_for(dtype) -> int:
    itemsize = jnp.dtype(dtype).itemsize
    return {4: 8, 2: 16, 1: 32}.get(itemsize, 8)


def _affine_kernel(x_ref, scale_ref, bias_ref, o_ref):
    # x/o: (tm, 128) lane-dense tiles.  scale/bias: (P, 128) phase-periodic
    # per-channel tables (constant block index -> VMEM-resident).  The
    # (tm,128)->(tm//P,P,128) reshape is tile-aligned (P % sublanes == 0) and
    # free; the broadcast along the leading dim keeps the body at one FMA per
    # vreg — pure VPU work, the kernel is HBM-bound.
    tm = x_ref.shape[0]
    p = scale_ref.shape[0]
    x = x_ref[...].reshape(tm // p, p, _LANES)
    y = x * scale_ref[...][None] + bias_ref[...][None]
    o_ref[...] = y.reshape(tm, _LANES)


def _apply_zscore(x, mean_row, inv_std_row, row_tile):
    """(x - mean) / std, per channel (last dim), via x * inv_std + bias."""
    shape = x.shape
    F = shape[-1]
    dtype = x.dtype
    total = math.prod(shape)

    sublanes = _sublanes_for(dtype)
    period = F // math.gcd(F, _LANES)                 # channel-phase period in rows
    P = period * sublanes // math.gcd(period, sublanes)  # lcm(period, sublanes)

    # Phase-periodic per-lane stats tables (tiny: P*128 elements).
    scale_row = inv_std_row.astype(dtype)
    bias_row = (-mean_row * inv_std_row).astype(dtype)
    idx = (jnp.arange(P * _LANES, dtype=jnp.int32) % F).reshape(P, _LANES)
    scale_slab = scale_row[idx]
    bias_slab = bias_row[idx]

    # Lane-dense slab.  When total % 128 == 0 this is a free bitcast.
    flat = x.reshape(total)
    pad = (-total) % _LANES
    if pad:
        # TODO(synk): this tail pad (and the matching output slice) costs one
        # extra XLA copy pass; arrange prod(shape) % 128 == 0 upstream to stay
        # on the zero-copy path.
        flat = jnp.pad(flat, (0, pad))
    rows = flat.shape[0] // _LANES
    x_ld = flat.reshape(rows, _LANES)

    # Tile: multiple of P (so every block starts at channel-phase 0 and the
    # reshape in the kernel is legal), capped near row_tile, never padded —
    # Pallas masks the partial final block.
    target = max(P, (row_tile // P) * P)
    tm = min(_round_up(rows, P), target)
    grid = pl.cdiv(rows, tm)

    out = pl.pallas_call(
        _affine_kernel,
        out_shape=jax.ShapeDtypeStruct((rows, _LANES), dtype),
        grid=(grid,),
        in_specs=[
            pl.BlockSpec((tm, _LANES), lambda i: (i, 0)),
            pl.BlockSpec((P, _LANES), lambda i: (0, 0)),   # VMEM-resident stats
            pl.BlockSpec((P, _LANES), lambda i: (0, 0)),
        ],
        out_specs=pl.BlockSpec((tm, _LANES), lambda i: (i, 0)),
        compiler_params=pltpu.CompilerParams(
            # TODO(synk): pltpu.CORE_PARALLEL (or pl.core_map) is the lever to
            # stream from both v7x TensorCores; kept "parallel" for portability.
            dimension_semantics=("parallel",)),
    )(x_ld, scale_slab, bias_slab)

    out_flat = out.reshape(rows * _LANES)
    if pad:
        out_flat = out_flat[:total]
    return out_flat.reshape(shape)


@functools.partial(jax.jit, static_argnames=("row_tile",))
def _scaler_forward(node_x, edge_x, node_mean, node_inv, edge_mean, edge_inv,
                    row_tile):
    # TODO(synk): node+edge could be fused into one pallas_call with a phased
    # grid, but a plain concat would reintroduce the full-array copies the
    # review asked to remove; both launches already share one jitted dispatch.
    return (_apply_zscore(node_x, node_mean, node_inv, row_tile),
            _apply_zscore(edge_x, edge_mean, edge_inv, row_tile))


@functools.partial(jax.jit, static_argnames=("row_tile",))
def _zscore_single(x, mean_row, inv_std_row, row_tile):
    return _apply_zscore(x, mean_row, inv_std_row, row_tile)


class StructuralDataScaler:
    """JAX/Pallas port of the PyTorch StructuralDataScaler forward pass."""

    def __init__(self, training_node_features, training_edge_features,
                 eps: float = 0.0, row_tile: int = _DEFAULT_ROW_TILE):
        # eps > 0 clamps std to avoid inf/nan on constant channels; default 0.0
        # matches PyTorch's divide-by-zero behavior exactly.
        self.x_index, self.y_index, self.z_index = 0, 1, 2
        self.radius_index, self.inclination_index, self.azimuth_index = 0, 1, 2
        self.row_tile = int(row_tile)

        # --- node statistics: unbiased std / mean over flattened (B*N) dim ---
        B, N, Fn = training_node_features.shape
        node_flat = training_node_features.reshape(B * N, Fn)
        node_std = jnp.std(node_flat, axis=0, ddof=1)   # torch.std_mean default
        node_mean = jnp.mean(node_flat, axis=0)
        self.node_std = node_std.reshape(1, 1, Fn)
        self.node_mean = node_mean.reshape(1, 1, Fn)
        self._node_mean_row = node_mean
        self._node_inv_std_row = 1.0 / jnp.maximum(node_std, eps)
        self.num_nodes = N

        # --- upper-triangle indices (offset=1) ---
        rows, cols = jnp.triu_indices(N, k=1)
        self.triu_rows = rows.astype(jnp.int32)
        self.triu_cols = cols.astype(jnp.int32)

        # --- edge statistics ---
        if training_edge_features.ndim > 3:
            training_edge_features = self.rectangular_to_triu(training_edge_features)
        Be, E, Fe = training_edge_features.shape
        edge_flat = training_edge_features.reshape(Be * E, Fe)
        edge_std = jnp.std(edge_flat, axis=0, ddof=1)
        edge_mean = jnp.mean(edge_flat, axis=0)
        self.edge_std = edge_std.reshape(1, 1, Fe)
        self.edge_mean = edge_mean.reshape(1, 1, Fe)
        self._edge_mean_row = edge_mean
        self._edge_inv_std_row = 1.0 / jnp.maximum(edge_std, eps)

    # --- forward: both z-score launches inside a single jitted dispatch ---
    def __call__(self, node_features, edge_features):
        return _scaler_forward(
            node_features, edge_features,
            self._node_mean_row, self._node_inv_std_row,
            self._edge_mean_row, self._edge_inv_std_row,
            row_tile=self.row_tile)

    def forward(self, node_features, edge_features):
        return self(node_features, edge_features)

    def node_features_to_z_scores(self, node_features):
        return _zscore_single(node_features, self._node_mean_row,
                              self._node_inv_std_row, row_tile=self.row_tile)

    def edge_features_to_z_scores(self, edge_features):
        return _zscore_single(edge_features, self._edge_mean_row,
                              self._edge_inv_std_row, row_tile=self.row_tile)

    # --- inverse transforms / utility glue (plain JAX; not on the Pallas path) ---
    def node_features_from_z_scores(self, node_z_scores):
        return self.node_mean + self.node_std * node_z_scores

    def edge_features_from_z_scores(self, edge_z_scores):
        return self.edge_mean + self.edge_std * edge_z_scores

    def rectangular_to_triu(self, edge_features_rectangular):
        return edge_features_rectangular[:, self.triu_rows, self.triu_cols, :]

    def triu_to_rectangular(self, edge_features_triu, diagonal_fill: float = 0.0):
        B, _, F = edge_features_triu.shape
        out = jnp.full((B, self.num_nodes, self.num_nodes, F), diagonal_fill,
                       dtype=edge_features_triu.dtype)
        out = out.at[:, self.triu_rows, self.triu_cols, :].set(edge_features_triu)
        out = out.at[:, self.triu_cols, self.triu_rows, :].set(edge_features_triu)
        return out

    def cartesian_to_spherical(self, node_features_cartesian):
        # TODO(synk): trig/scatter utility glue — plain JAX, no Pallas form needed.
        x = node_features_cartesian[:, :, self.x_index]
        y = node_features_cartesian[:, :, self.y_index]
        z = node_features_cartesian[:, :, self.z_index]
        x2y2 = x * x + y * y
        radius = jnp.sqrt(x2y2 + z * z)
        inclination = jnp.arccos(z / radius)
        azimuth = jnp.sign(y) * jnp.arccos(x / jnp.sqrt(x2y2))
        out = node_features_cartesian
        out = out.at[:, :, self.radius_index].set(radius)
        out = out.at[:, :, self.inclination_index].set(inclination)
        out = out.at[:, :, self.azimuth_index].set(azimuth)
        return out

    def spherical_to_cartesian(self, node_features_spherical):
        # NOTE: the original torch code overwrote x_index three times (bug);
        # the intended conversion is implemented here.
        radius = node_features_spherical[:, :, self.radius_index]
        inclination = node_features_spherical[:, :, self.inclination_index]
        azimuth = node_features_spherical[:, :, self.azimuth_index]
        sin_inc = jnp.sin(inclination)
        out = node_features_spherical
        out = out.at[:, :, self.x_index].set(radius * sin_inc * jnp.cos(azimuth))
        out = out.at[:, :, self.y_index].set(radius * sin_inc * jnp.sin(azimuth))
        out = out.at[:, :, self.z_index].set(radius * jnp.cos(inclination))
        return out


if __name__ == "__main__":
    key = jax.random.PRNGKey(0)
    k1, k2, k3, k4 = jax.random.split(key, 4)

    # Small, module-consistent shapes chosen so prod(shape) % 128 == 0 for both
    # tensors -> the zero-copy lane-dense path is exercised end to end.
    B_train, N, F_node, F_edge = 8, 64, 4, 3
    B = 4
    E = N * (N - 1) // 2          # 2016;  B*E*F_edge = 24192 = 189 * 128

    training_node = jax.random.normal(k1, (B_train, N, F_node), dtype=jnp.float32) * 2.0 + 0.5
    training_edge_rect = jax.random.normal(k2, (B_train, N, N, F_edge), dtype=jnp.float32) * 3.0 - 1.0

    scaler = StructuralDataScaler(training_node, training_edge_rect)

    node_features = jax.random.normal(k3, (B, N, F_node), dtype=jnp.float32)
    edge_features = jax.random.normal(k4, (B, E, F_edge), dtype=jnp.float32)

    node_z, edge_z = scaler(node_features, edge_features)
    node_z = jax.block_until_ready(node_z)
    edge_z = jax.block_until_ready(edge_z)

    # Reference check against plain-JAX semantics of the PyTorch module.
    ref_node = (node_features - scaler.node_mean) / scaler.node_std
    ref_edge = (edge_features - scaler.edge_mean) / scaler.edge_std
    assert node_z.shape == (B, N, F_node) and node_z.dtype == jnp.float32
    assert edge_z.shape == (B, E, F_edge) and edge_z.dtype == jnp.float32
    assert jnp.allclose(node_z, ref_node, atol=1e-5, rtol=1e-5)
    assert jnp.allclose(edge_z, ref_edge, atol=1e-5, rtol=1e-5)

    print("KERNEL_OK")
</pallas_src>

<mosaic_0001>
module attributes {stable_mosaic.version = 11 : i64} {
  func.func @_affine_kernel(%arg0: i32, %arg1: memref<8x128xf32, #tpu.memory_space<vmem>>, %arg2: memref<8x128xf32, #tpu.memory_space<vmem>>, %arg3: memref<8x128xf32, #tpu.memory_space<vmem>>, %arg4: memref<8x128xf32, #tpu.memory_space<vmem>>) attributes {dimension_semantics = [#tpu.dimension_semantics<parallel>], iteration_bounds = array<i64: 1>, scalar_prefetch = 0 : i64, scratch_operands = 0 : i64, tpu.core_type = #tpu.core_type<tc>, window_params = [{transform_indices = @transform_0, window_bounds = array<i64: 8, 128>}, {pipeline_mode = #tpu.pipeline_mode<synchronous>, transform_indices = @transform_1, window_bounds = array<i64: 8, 128>}, {pipeline_mode = #tpu.pipeline_mode<synchronous>, transform_indices = @transform_2, window_bounds = array<i64: 8, 128>}, {transform_indices = @transform_3, window_bounds = array<i64: 8, 128>}]} {
    %c0 = arith.constant 0 : index
    %c0_0 = arith.constant 0 : index
    %0 = vector.load %arg1[%c0, %c0_0] : memref<8x128xf32, #tpu.memory_space<vmem>>, vector<8x128xf32>
    %1 = vector.shape_cast %0 : vector<8x128xf32> to vector<1x8x128xf32>
    %c0_1 = arith.constant 0 : index
    %c0_2 = arith.constant 0 : index
    %2 = vector.load %arg2[%c0_1, %c0_2] : memref<8x128xf32, #tpu.memory_space<vmem>>, vector<8x128xf32>
    %3 = vector.shape_cast %2 : vector<8x128xf32> to vector<1x8x128xf32>
    %4 = arith.mulf %1, %3 : vector<1x8x128xf32>
    %c0_3 = arith.constant 0 : index
    %c0_4 = arith.constant 0 : index
    %5 = vector.load %arg3[%c0_3, %c0_4] : memref<8x128xf32, #tpu.memory_space<vmem>>, vector<8x128xf32>
    %6 = vector.shape_cast %5 : vector<8x128xf32> to vector<1x8x128xf32>
    %7 = arith.addf %4, %6 : vector<1x8x128xf32>
    %8 = vector.shape_cast %7 : vector<1x8x128xf32> to vector<8x128xf32>
    %c0_5 = arith.constant 0 : index
    %c0_6 = arith.constant 0 : index
    %9 = vector.load %arg4[%c0_5, %c0_6] : memref<8x128xf32, #tpu.memory_space<vmem>>, vector<8x128xf32>
    tpu.vector_store %arg4[%c0_5, %c0_6], %8 {strides = array<i32>} : memref<8x128xf32, #tpu.memory_space<vmem>>, vector<8x128xf32>,
    return
  }
  func.func @transform_0(%arg0: i32) -> (i32, i32) {
    %c0_i32 = arith.constant 0 : i32
    %c0_i32_0 = arith.constant 0 : i32
    return %arg0, %c0_i32 : i32, i32
  }
  func.func @transform_1(%arg0: i32) -> (i32, i32) {
    %c0_i32 = arith.constant 0 : i32
    %c0_i32_0 = arith.constant 0 : i32
    %c0_i32_1 = arith.constant 0 : i32
    return %c0_i32, %c0_i32_0 : i32, i32
  }
  func.func @transform_2(%arg0: i32) -> (i32, i32) {
    %c0_i32 = arith.constant 0 : i32
    %c0_i32_0 = arith.constant 0 : i32
    %c0_i32_1 = arith.constant 0 : i32
    return %c0_i32, %c0_i32_0 : i32, i32
  }
  func.func @transform_3(%arg0: i32) -> (i32, i32) {
    %c0_i32 = arith.constant 0 : i32
    %c0_i32_0 = arith.constant 0 : i32
    return %arg0, %c0_i32 : i32, i32
  }
}

module attributes {stable_mosaic.version = 11 : i64} {
  func.func @_affine_kernel(%arg0: i32, %arg1: memref<192x128xf32, #tpu.memory_space<vmem>>, %arg2: memref<24x128xf32, #tpu.memory_space<vmem>>, %arg3: memref<24x128xf32, #tpu.memory_space<vmem>>, %arg4: memref<192x128xf32, #tpu.memory_space<vmem>>) attributes {dimension_semantics = [#tpu.dimension_semantics<parallel>], iteration_bounds = array<i64: 1>, scalar_prefetch = 0 : i64, scratch_operands = 0 : i64, tpu.core_type = #tpu.core_type<tc>, window_params = [{transform_indices = @transform_0, window_bounds = array<i64: 192, 128>}, {pipeline_mode = #tpu.pipeline_mode<synchronous>, transform_indices = @transform_1, window_bounds = array<i64: 24, 128>}, {pipeline_mode = #tpu.pipeline_mode<synchronous>, transform_indices = @transform_2, window_bounds = array<i64: 24, 128>}, {transform_indices = @transform_3, window_bounds = array<i64: 192, 128>}]} {
    %c0 = arith.constant 0 : index
    %c0_0 = arith.constant 0 : index
    %0 = vector.load %arg1[%c0, %c0_0] : memref<192x128xf32, #tpu.memory_space<vmem>>, vector<192x128xf32>
    %1 = vector.shape_cast %0 : vector<192x128xf32> to vector<8x24x128xf32>
    %c0_1 = arith.constant 0 : index
    %c0_2 = arith.constant 0 : index
    %2 = vector.load %arg2[%c0_1, %c0_2] : memref<24x128xf32, #tpu.memory_space<vmem>>, vector<24x128xf32>
    %3 = vector.shape_cast %2 : vector<24x128xf32> to vector<1x24x128xf32>
    %4 = vector.broadcast %3 : vector<1x24x128xf32> to vector<8x24x128xf32>
    %5 = arith.mulf %1, %4 : vector<8x24x128xf32>
    %c0_3 = arith.constant 0 : index
    %c0_4 = arith.constant 0 : index
    %6 = vector.load %arg3[%c0_3, %c0_4] : memref<24x128xf32, #tpu.memory_space<vmem>>, vector<24x128xf32>
    %7 = vector.shape_cast %6 : vector<24x128xf32> to vector<1x24x128xf32>
    %8 = vector.broadcast %7 : vector<1x24x128xf32> to vector<8x24x128xf32>
    %9 = arith.addf %5, %8 : vector<8x24x128xf32>
    %10 = vector.shape_cast %9 : vector<8x24x128xf32> to vector<192x128xf32>
    %c0_5 = arith.constant 0 : index
    %c0_6 = arith.constant 0 : index
    %11 = vector.load %arg4[%c0_5, %c0_6] : memref<192x128xf32, #tpu.memory_space<vmem>>, vector<192x128xf32>
    tpu.vector_store %arg4[%c0_5, %c0_6], %10 {strides = array<i32>} : memref<192x128xf32, #tpu.memory_space<vmem>>, vector<192x128xf32>,
    return
  }
  func.func @transform_0(%arg0: i32) -> (i32, i32) {
    %c0_i32 = arith.constant 0 : i32
    %c0_i32_0 = arith.constant 0 : i32
    return %arg0, %c0_i32 : i32, i32
  }
  func.func @transform_1(%arg0: i32) -> (i32, i32) {
    %c0_i32 = arith.constant 0 : i32
    %c0_i32_0 = arith.constant 0 : i32
    %c0_i32_1 = arith.constant 0 : i32
    return %c0_i32, %c0_i32_0 : i32, i32
  }
  func.func @transform_2(%arg0: i32) -> (i32, i32) {
    %c0_i32 = arith.constant 0 : i32
    %c0_i32_0 = arith.constant 0 : i32
    %c0_i32_1 = arith.constant 0 : i32
    return %c0_i32, %c0_i32_0 : i32, i32
  }
  func.func @transform_3(%arg0: i32) -> (i32, i32) {
    %c0_i32 = arith.constant 0 : i32
    %c0_i32_0 = arith.constant 0 : i32
    return %arg0, %c0_i32 : i32, i32
  }
}

</mosaic_0001>

<bundles_post_ra>
// kernel: _scaler_forward.2
= control target key start
LH: loop header
LB: loop body
LE: loop exit
PB: predicated region body
PF: predicated region fallthrough
CT: control target
= control target key end

     0   :  { %s56_s0 = inlined_call_operand.vmem [shape: f32[8,128], index: 0, kind: input, shape index: {}]   ;;  %s57_s1 = inlined_call_operand.vmem [shape: f32[8,128], index: 1, kind: input, shape index: {}]   ;;  %s58_s2 = inlined_call_operand.vmem [shape: f32[8,128], index: 2, kind: input, shape index: {}]   ;;  %s59_s3 = inlined_call_operand.vmem [shape: f32[8,128], index: 3, kind: output, shape index: {}]  }
   0x1   :  { %v14_v0 = vld [vmem:[%s56_s0] sm:$0xff] }
   0x2   :  { %v15_v1 = vld [vmem:[%s57_s1] sm:$0xff] }
   0x3   :  { %v17_v2 = vld [vmem:[%s58_s2] sm:$0xff]  ;;  %v16_v3 = vmul.f32 %v15_v1, %v14_v0 }
   0x5   :  { %v18_v4 = vadd.f32 %v17_v2, %v16_v3 }
   0x7   :  { %19 = vst [vmem:[%s59_s3] sm:$0xff] %v18_v4 }

// kernel: _scaler_forward.3
= control target key start
LH: loop header
LB: loop body
LE: loop exit
PB: predicated region body
PF: predicated region fallthrough
CT: control target
= control target key end

     0   :  { %s362_s0 = inlined_call_operand.vmem [shape: f32[189,128], index: 0, kind: input, shape index: {}]   ;;  %s363_s1 = inlined_call_operand.vmem [shape: f32[24,128], index: 1, kind: input, shape index: {}]   ;;  %s364_s2 = inlined_call_operand.vmem [shape: f32[24,128], index: 2, kind: input, shape index: {}]   ;;  %s365_s3 = inlined_call_operand.vmem [shape: f32[189,128], index: 3, kind: output, shape index: {}]  }
   0x1   :  { %v14_v0 = vld [vmem:[%s362_s0] sm:$0xff]  ;;  %v15_v4 = vld [vmem:[%s362_s0 + $0x8] sm:$0xff]  ;;  %v16_v8 = vld [vmem:[%s362_s0 + $0x10] sm:$0xff] }
   0x2   :  { %v146_v1 = vld [vmem:[%s363_s1] sm:$0xff]  ;;  %v160_v5 = vld [vmem:[%s363_s1 + $0x8] sm:$0xff]  ;;  %v174_v9 = vld [vmem:[%s363_s1 + $0x10] sm:$0xff] }
   0x3   :  { %v151_v2 = vld [vmem:[%s364_s2] sm:$0xff]  ;;  %v41_v3 = vmul.f32 %v146_v1, %v14_v0  ;;  %v165_v6 = vld [vmem:[%s364_s2 + $0x8] sm:$0xff]  ;;  %v42_v7 = vmul.f32 %v160_v5, %v15_v4  ;;  %v179_v10 = vld [vmem:[%s364_s2 + $0x10] sm:$0xff]  ;;  %v43_v12 = vmul.f32 %v174_v9, %v16_v8 }
   0x4   :  { %v17_v13 = vld [vmem:[%s362_s0 + $0x18] sm:$0xff]  ;;  %v18_v14 = vld [vmem:[%s362_s0 + $0x20] sm:$0xff]  ;;  %v19_v15 = vld [vmem:[%s362_s0 + $0x28] sm:$0xff] }
   0x5   :  { %v68_v11 = vadd.f32 %v151_v2, %v41_v3  ;;  %v69_v16 = vadd.f32 %v165_v6, %v42_v7  ;;  %v44_v17 = vmul.f32 %v146_v1, %v17_v13  ;;  %v45_v18 = vmul.f32 %v160_v5, %v18_v14  ;;  %v20_v20 = vld [vmem:[%s362_s0 + $0x30] sm:$0xff]  ;;  %v21_v21 = vld [vmem:[%s362_s0 + $0x38] sm:$0xff]  ;;  %v22_v22 = vld [vmem:[%s362_s0 + $0x40] sm:$0xff] }
   0x6   :  { %v46_v19 = vmul.f32 %v174_v9, %v19_v15  ;;  %v70_v23 = vadd.f32 %v179_v10, %v43_v12  ;;  %v47_v24 = vmul.f32 %v146_v1, %v20_v20  ;;  %v48_v25 = vmul.f32 %v160_v5, %v21_v21  ;;  %v23_v27 = vld [vmem:[%s362_s0 + $0x48] sm:$0xff]  ;;  %v24_v28 = vld [vmem:[%s362_s0 + $0x50] sm:$0xff]  ;;  %v25_v29 = vld [vmem:[%s362_s0 + $0x58] sm:$0xff] }
   0x7   :  { %92 = vst [vmem:[%s365_s3] sm:$0xff] %v68_v11  ;;  %v49_v26 = vmul.f32 %v174_v9, %v22_v22  ;;  %93 = vst [vmem:[%s365_s3 + $0x8] sm:$0xff] %v69_v16  ;;  %v71_v30 = vadd.f32 %v151_v2, %v44_v17  ;;  %v72_v31 = vadd.f32 %v165_v6, %v45_v18  ;;  %v26_v34 = vld [vmem:[%s362_s0 + $0x60] sm:$0xff]  ;;  %v27_v35 = vld [vmem:[%s362_s0 + $0x68] sm:$0xff] }
   0x8   :  { %v73_v32 = vadd.f32 %v179_v10, %v46_v19  ;;  %v50_v33 = vmul.f32 %v146_v1, %v23_v27  ;;  %v28_v36 = vld [vmem:[%s362_s0 + $0x70] sm:$0xff]  ;;  %94 = vst [vmem:[%s365_s3 + $0x10] sm:$0xff] %v70_v23  ;;  %v74_v37 = vadd.f32 %v151_v2, %v47_v24  ;;  %v75_v38 = vadd.f32 %v165_v6, %v48_v25  ;;  %v29_v41 = vld [vmem:[%s362_s0 + $0x78] sm:$0xff]  ;;  %v30_v42 = vld [vmem:[%s362_s0 + $0x80] sm:$0xff] }
   0x9   :  { %v76_v39 = vadd.f32 %v179_v10, %v49_v26  ;;  %v51_v40 = vmul.f32 %v160_v5, %v24_v28  ;;  %v31_v43 = vld [vmem:[%s362_s0 + $0x88] sm:$0xff]  ;;  %95 = vst [vmem:[%s365_s3 + $0x18] sm:$0xff] %v71_v30  ;;  %96 = vst [vmem:[%s365_s3 + $0x20] sm:$0xff] %v72_v31  ;;  %v52_v45 = vmul.f32 %v174_v9, %v25_v29  ;;  %v32_v48 = vld [vmem:[%s362_s0 + $0x90] sm:$0xff] }
   0xa   :  { %97 = vst [vmem:[%s365_s3 + $0x28] sm:$0xff] %v73_v32  ;;  %v77_v44 = vadd.f32 %v151_v2, %v50_v33  ;;  %v53_v46 = vmul.f32 %v146_v1, %v26_v34  ;;  %v54_v47 = vmul.f32 %v160_v5, %v27_v35  ;;  %98 = vst [vmem:[%s365_s3 + $0x30] sm:$0xff] %v74_v37  ;;  %v33_v53 = vld [vmem:[%s362_s0 + $0x98] sm:$0xff]  ;;  %v34_v54 = vld [vmem:[%s362_s0 + $0xa0] sm:$0xff] }
   0xb   :  { %99 = vst [vmem:[%s365_s3 + $0x38] sm:$0xff] %v75_v38  ;;  %100 = vst [vmem:[%s365_s3 + $0x40] sm:$0xff] %v76_v39  ;;  %v78_v49 = vadd.f32 %v165_v6, %v51_v40  ;;  %v55_v50 = vmul.f32 %v174_v9, %v28_v36  ;;  %v56_v51 = vmul.f32 %v146_v1, %v29_v41  ;;  %v35_v55 = vld [vmem:[%s362_s0 + $0xa8] sm:$0xff]  ;;  %v36_v60 = vld [vmem:[%s362_s0 + $0xb0] sm:$0xff] }
   0xc   :  { %v57_v52 = vmul.f32 %v160_v5, %v30_v42  ;;  %101 = vst [vmem:[%s365_s3 + $0x48] sm:$0xff] %v77_v44  ;;  %v79_v56 = vadd.f32 %v179_v10, %v52_v45  ;;  %v80_v57 = vadd.f32 %v151_v2, %v53_v46  ;;  %v81_v58 = vadd.f32 %v165_v6, %v54_v47  ;;  %v37_v61 = vld [vmem:[%s362_s0 + $0xb8] sm:$0xff] }
   0xd   :  { %v58_v59 = vmul.f32 %v174_v9, %v31_v43  ;;  %102 = vst [vmem:[%s365_s3 + $0x50] sm:$0xff] %v78_v49  ;;  %v82_v62 = vadd.f32 %v179_v10, %v55_v50  ;;  %v83_v63 = vadd.f32 %v151_v2, %v56_v51  ;;  %v59_v3 = vmul.f32 %v146_v1, %v32_v48 }
   0xe   :  { %v84_v0 = vadd.f32 %v165_v6, %v57_v52  ;;  %103 = vst [vmem:[%s365_s3 + $0x58] sm:$0xff] %v79_v56  ;;  %104 = vst [vmem:[%s365_s3 + $0x60] sm:$0xff] %v80_v57  ;;  %v60_v7 = vmul.f32 %v160_v5, %v33_v53  ;;  %v61_v8 = vmul.f32 %v174_v9, %v34_v54 }
   0xf   :  { %105 = vst [vmem:[%s365_s3 + $0x68] sm:$0xff] %v81_v58  ;;  %v85_v4 = vadd.f32 %v179_v10, %v58_v59  ;;  %v62_v11 = vmul.f32 %v146_v1, %v35_v55  ;;  %106 = vst [vmem:[%s365_s3 + $0x70] sm:$0xff] %v82_v62  ;;  %v86_v12 = vadd.f32 %v151_v2, %v59_v3 }
  0x10   :  { %107 = vst [vmem:[%s365_s3 + $0x78] sm:$0xff] %v83_v63  ;;  %108 = vst [vmem:[%s365_s3 + $0x80] sm:$0xff] %v84_v0  ;;  %v63_v13 = vmul.f32 %v160_v5, %v36_v60  ;;  %v64_v14 = vmul.f32 %v174_v9, %v37_v61  ;;  %v87_v1 = vadd.f32 %v165_v6, %v60_v7 }
  0x11   :  { %109 = vst [vmem:[%s365_s3 + $0x88] sm:$0xff] %v85_v4  ;;  %v88_v15 = vadd.f32 %v179_v10, %v61_v8  ;;  %v89_v16 = vadd.f32 %v151_v2, %v62_v11  ;;  %110 = vst [vmem:[%s365_s3 + $0x90] sm:$0xff] %v86_v12 }
  0x12   :  { %v90_v17 = vadd.f32 %v165_v6, %v63_v13  ;;  %v91_v5 = vadd.f32 %v179_v10, %v64_v14  ;;  %111 = vst [vmem:[%s365_s3 + $0x98] sm:$0xff] %v87_v1 }
  0x13   :  { %112 = vst [vmem:[%s365_s3 + $0xa0] sm:$0xff] %v88_v15  ;;  %113 = vst [vmem:[%s365_s3 + $0xa8] sm:$0xff] %v89_v16 }
  0x14   :  { %114 = vst [vmem:[%s365_s3 + $0xb0] sm:$0xff] %v90_v17  ;;  %115 = vst [vmem:[%s365_s3 + $0xb8] sm:$0xff] %v91_v5 }

</bundles_post_ra>
